<compile_context>
chip_gen: v7x
topology: tpu7x:2x2x1
jax: 0.10.0
libtpu: 0.0.40
codegen_flags: <defaults>
</compile_context>

<pallas_src>
import functools

import jax
import jax.numpy as jnp
import numpy as np
from jax.experimental import pallas as pl
from jax.experimental.pallas import tpu as pltpu

LANE = 128


def _series_decomp_kernel(x_ref, res_ref, mean_ref, *, kernel_size):
    """Block = (1, L, TC); moving average runs along L (axis 1)."""
    k = kernel_size
    pad = (k - 1) // 2
    _, L, _ = x_ref.shape
    inv_k = 1.0 / k

    xf = x_ref[0].astype(jnp.float32)            # (L, TC)

    # ---- interior rows: cyclic window sum (exact for pad <= t <= L-1-pad) --
    if pad == 0:
        mean = xf
    elif k <= 7:
        # Small k: symmetric roll pair per offset (roll-sign agnostic).
        acc = xf
        for s in range(1, pad + 1):
            acc = acc + pltpu.roll(xf, s, axis=0) + pltpu.roll(xf, L - s, axis=0)
        mean = acc * inv_k
    else:
        # Large k: log-depth shift-doubling window sum.
        #   acc accumulates a width-r window sum, S holds the current
        #   power-of-two width-w block sum; combine per the binary
        #   decomposition of k, then one centering roll by L - pad.
        acc = None
        r = 0            # width of the accumulated window sum
        S = xf           # current power-of-two block sum, width w
        w = 1
        kk = k
        while True:
            if kk & 1:
                if acc is None:
                    acc, r = S, w
                else:
                    acc = acc + pltpu.roll(S, r, axis=0)
                    r += w
            kk >>= 1
            if kk == 0:
                break
            S = S + pltpu.roll(S, w, axis=0)
            w *= 2
        mean = pltpu.roll(acc, L - pad, axis=0) * inv_k

    mean_ref[0] = mean.astype(mean_ref.dtype)
    res_ref[0] = (xf - mean).astype(res_ref.dtype)

    # ---- boundary rows: overwrite with exact replicate-padded means --------
    # Batched into one (pad, TC) store per side per output (4 stores/block)
    # instead of 4*pad masked single-row stores.
    if pad > 0:
        x0 = xf[0:1, :]                      # (1, TC)
        xl = xf[L - 1:L, :]                  # (1, TC)

        # front rows t = 0..pad-1:
        #   mean[t] = ((pad - t) * x[0] + sum_{i=0..t+pad} x[i]) / k
        run = x0
        for i in range(1, pad + 1):
            run = run + xf[i:i + 1, :]
        front_m, front_r = [], []
        for t in range(pad):
            m_row = ((pad - t) * x0 + run) * inv_k
            front_m.append(m_row)
            front_r.append(xf[t:t + 1, :] - m_row)
            if t + 1 < pad:
                run = run + xf[t + 1 + pad:t + 2 + pad, :]
        front_m = jnp.concatenate(front_m, axis=0)           # (pad, TC)
        front_r = jnp.concatenate(front_r, axis=0)
        mean_ref[0, 0:pad, :] = front_m.astype(mean_ref.dtype)
        res_ref[0, 0:pad, :] = front_r.astype(res_ref.dtype)

        # back rows t = L-1-j, j = 0..pad-1:
        #   mean[t] = ((pad - j) * x[L-1] + sum_{i=t-pad..L-1} x[i]) / k
        run = xl
        for i in range(1, pad + 1):
            run = run + xf[L - 1 - i:L - i, :]
        back_m, back_r = [], []
        for j in range(pad):
            t = L - 1 - j
            m_row = ((pad - j) * xl + run) * inv_k
            back_m.append(m_row)
            back_r.append(xf[t:t + 1, :] - m_row)
            if j + 1 < pad:
                nxt = L - 1 - (j + 1) - pad
                run = run + xf[nxt:nxt + 1, :]
        back_m = jnp.concatenate(back_m[::-1], axis=0)        # rows L-pad..L-1
        back_r = jnp.concatenate(back_r[::-1], axis=0)
        mean_ref[0, L - pad:L, :] = back_m.astype(mean_ref.dtype)
        res_ref[0, L - pad:L, :] = back_r.astype(res_ref.dtype)


def series_decomp(x, kernel_size):
    """x: (B, L, C). Returns (res, moving_mean), each (B, L, C)."""
    assert kernel_size % 2 == 1, "series_decomp requires odd kernel_size"
    B, L, C = x.shape
    assert L >= kernel_size, "sequence length must be >= kernel_size"

    # Small/ragged C: fold batch into the lane axis so padding to 128 lanes
    # does not inflate HBM traffic (the op is independent per (b, c) column).
    fold_batch = (C % LANE != 0) and (B > 1)
    if fold_batch:
        x_in = jnp.transpose(x, (1, 0, 2)).reshape(1, L, B * C)
    else:
        x_in = x
    Bk, _, Ck = x_in.shape

    C_pad = ((Ck + LANE - 1) // LANE) * LANE
    x_p = x_in if C_pad == Ck else jnp.pad(
        x_in, ((0, 0), (0, 0), (0, C_pad - Ck)))

    # Per-block element budget (~2 MiB f32 per block). With 2x input + 4x
    # output double buffers and ~5 f32 temporaries this stays well inside the
    # explicit 48 MiB scoped-VMEM limit on every TPU generation.
    max_block_elems = 512 * 1024

    # Channel tile: multiples of 128 dividing C_pad that fit the budget,
    # biggest first; prefer the largest one that still yields >= 4 grid
    # steps (keeps both v7x TensorCores busy and preserves pipelining).
    candidates = [c for c in range(C_pad, 0, -LANE)
                  if C_pad % c == 0 and L * c <= max_block_elems]
    if not candidates:
        candidates = [LANE]
    TC = candidates[0]
    for c in candidates:
        if Bk * (C_pad // c) >= 4:
            TC = c
            break

    grid = (Bk, C_pad // TC)
    blk = pl.BlockSpec((1, L, TC), lambda i, j: (i, 0, j))

    kern = functools.partial(_series_decomp_kernel, kernel_size=kernel_size)
    res, mean = pl.pallas_call(
        kern,
        out_shape=(
            jax.ShapeDtypeStruct((Bk, L, C_pad), x.dtype),
            jax.ShapeDtypeStruct((Bk, L, C_pad), x.dtype),
        ),
        grid_spec=pl.GridSpec(grid=grid, in_specs=[blk], out_specs=(blk, blk)),
        compiler_params=pltpu.CompilerParams(
            dimension_semantics=("parallel", "parallel"),
            vmem_limit_bytes=48 * 1024 * 1024,
        ),
    )(x_p)

    if C_pad != Ck:
        res = res[..., :Ck]
        mean = mean[..., :Ck]
    if fold_batch:
        res = res.reshape(L, B, C).transpose(1, 0, 2)
        mean = mean.reshape(L, B, C).transpose(1, 0, 2)
    return res, mean


def _series_decomp_ref(x, kernel_size):
    """Plain-JAX reference mirroring the PyTorch module, for verification."""
    pad = (kernel_size - 1) // 2
    front = jnp.repeat(x[:, 0:1, :], pad, axis=1)
    end = jnp.repeat(x[:, -1:, :], pad, axis=1)
    xp = jnp.concatenate([front, x, end], axis=1)          # (B, L+2p, C)
    windows = jnp.stack(
        [xp[:, j:j + x.shape[1], :] for j in range(kernel_size)], axis=0
    )
    mean = jnp.mean(windows, axis=0)
    return x - mean, mean


if __name__ == "__main__":
    # Case 1: ETT-style ragged C=7 with PowerMamba k=25 -> batch-folded lanes
    #         + log-depth window sum.
    # Case 2: C multiple of 128 with several channel tiles, small k -> roll
    #         pair path, multi-tile grid.
    # Case 3: fold-batch with B=3 and k=9 -> another log-depth decomposition.
    cases = [(2, 32, 7, 25), (2, 48, 384, 5), (3, 40, 20, 9)]
    key = jax.random.PRNGKey(0)
    for (B, L, C, k) in cases:
        key, sub = jax.random.split(key)
        x = jax.random.normal(sub, (B, L, C), dtype=jnp.float32)

        res, mean = series_decomp(x, k)
        jax.block_until_ready((res, mean))

        res_ref, mean_ref = _series_decomp_ref(x, k)
        np.testing.assert_allclose(np.asarray(mean), np.asarray(mean_ref),
                                   rtol=1e-5, atol=1e-5)
        np.testing.assert_allclose(np.asarray(res), np.asarray(res_ref),
                                   rtol=1e-5, atol=1e-5)

    print("KERNEL_OK")
</pallas_src>

<mosaic_0001>
module attributes {stable_mosaic.version = 11 : i64} {
  func.func @_series_decomp_kernel(%arg0: i32, %arg1: i32, %arg2: memref<1x32x128xf32, #tpu.memory_space<vmem>>, %arg3: memref<1x32x128xf32, #tpu.memory_space<vmem>>, %arg4: memref<1x32x128xf32, #tpu.memory_space<vmem>>) attributes {dimension_semantics = [#tpu.dimension_semantics<parallel>, #tpu.dimension_semantics<parallel>], iteration_bounds = array<i64: 1, 1>, scalar_prefetch = 0 : i64, scratch_operands = 0 : i64, tpu.core_type = #tpu.core_type<tc>, window_params = [{transform_indices = @transform_0, window_bounds = array<i64: 1, 32, 128>}, {transform_indices = @transform_1, window_bounds = array<i64: 1, 32, 128>}, {transform_indices = @transform_2, window_bounds = array<i64: 1, 32, 128>}]} {
    %c0 = arith.constant 0 : index
    %c0_0 = arith.constant 0 : index
    %c0_1 = arith.constant 0 : index
    %0 = vector.load %arg2[%c0, %c0_0, %c0_1] : memref<1x32x128xf32, #tpu.memory_space<vmem>>, vector<1x32x128xf32>
    %1 = vector.shape_cast %0 : vector<1x32x128xf32> to vector<32x128xf32>
    %c1_i32 = arith.constant 1 : i32
    %2 = tpu.dynamic_rotate %1 by %c1_i32 dim 0 : vector<32x128xf32>, i32 -> vector<32x128xf32>
    %3 = arith.addf %1, %2 : vector<32x128xf32>
    %c2_i32 = arith.constant 2 : i32
    %4 = tpu.dynamic_rotate %3 by %c2_i32 dim 0 : vector<32x128xf32>, i32 -> vector<32x128xf32>
    %5 = arith.addf %3, %4 : vector<32x128xf32>
    %c4_i32 = arith.constant 4 : i32
    %6 = tpu.dynamic_rotate %5 by %c4_i32 dim 0 : vector<32x128xf32>, i32 -> vector<32x128xf32>
    %7 = arith.addf %5, %6 : vector<32x128xf32>
    %c1_i32_2 = arith.constant 1 : i32
    %8 = tpu.dynamic_rotate %7 by %c1_i32_2 dim 0 : vector<32x128xf32>, i32 -> vector<32x128xf32>
    %9 = arith.addf %1, %8 : vector<32x128xf32>
    %c8_i32 = arith.constant 8 : i32
    %10 = tpu.dynamic_rotate %7 by %c8_i32 dim 0 : vector<32x128xf32>, i32 -> vector<32x128xf32>
    %11 = arith.addf %7, %10 : vector<32x128xf32>
    %c9_i32 = arith.constant 9 : i32
    %12 = tpu.dynamic_rotate %11 by %c9_i32 dim 0 : vector<32x128xf32>, i32 -> vector<32x128xf32>
    %13 = arith.addf %9, %12 : vector<32x128xf32>
    %c20_i32 = arith.constant 20 : i32
    %14 = tpu.dynamic_rotate %13 by %c20_i32 dim 0 : vector<32x128xf32>, i32 -> vector<32x128xf32>
    %cst = arith.constant 4.000000e-02 : f32
    %15 = vector.broadcast %cst : f32 to vector<32x128xf32>
    %16 = arith.mulf %14, %15 : vector<32x128xf32>
    %c0_3 = arith.constant 0 : index
    %c0_4 = arith.constant 0 : index
    %c0_5 = arith.constant 0 : index
    %17 = vector.load %arg4[%c0_3, %c0_4, %c0_5] : memref<1x32x128xf32, #tpu.memory_space<vmem>>, vector<1x32x128xf32>
    %18 = vector.shape_cast %17 : vector<1x32x128xf32> to vector<32x128xf32>
    %19 = vector.shape_cast %16 : vector<32x128xf32> to vector<1x32x128xf32>
    tpu.vector_store %arg4[%c0_3, %c0_4, %c0_5], %19 {strides = array<i32>} : memref<1x32x128xf32, #tpu.memory_space<vmem>>, vector<1x32x128xf32>,
    %20 = arith.subf %1, %16 : vector<32x128xf32>
    %c0_6 = arith.constant 0 : index
    %c0_7 = arith.constant 0 : index
    %c0_8 = arith.constant 0 : index
    %21 = vector.load %arg3[%c0_6, %c0_7, %c0_8] : memref<1x32x128xf32, #tpu.memory_space<vmem>>, vector<1x32x128xf32>
    %22 = vector.shape_cast %21 : vector<1x32x128xf32> to vector<32x128xf32>
    %23 = vector.shape_cast %20 : vector<32x128xf32> to vector<1x32x128xf32>
    tpu.vector_store %arg3[%c0_6, %c0_7, %c0_8], %23 {strides = array<i32>} : memref<1x32x128xf32, #tpu.memory_space<vmem>>, vector<1x32x128xf32>,
    %24 = vector.extract_strided_slice %1 {offsets = [0, 0], sizes = [1, 128], strides = [1, 1]} : vector<32x128xf32> to vector<1x128xf32>
    %25 = vector.extract_strided_slice %1 {offsets = [31, 0], sizes = [1, 128], strides = [1, 1]} : vector<32x128xf32> to vector<1x128xf32>
    %26 = vector.extract_strided_slice %1 {offsets = [1, 0], sizes = [1, 128], strides = [1, 1]} : vector<32x128xf32> to vector<1x128xf32>
    %27 = arith.addf %24, %26 : vector<1x128xf32>
    %28 = vector.extract_strided_slice %1 {offsets = [2, 0], sizes = [1, 128], strides = [1, 1]} : vector<32x128xf32> to vector<1x128xf32>
    %29 = arith.addf %27, %28 : vector<1x128xf32>
    %30 = vector.extract_strided_slice %1 {offsets = [3, 0], sizes = [1, 128], strides = [1, 1]} : vector<32x128xf32> to vector<1x128xf32>
    %31 = arith.addf %29, %30 : vector<1x128xf32>
    %32 = vector.extract_strided_slice %1 {offsets = [4, 0], sizes = [1, 128], strides = [1, 1]} : vector<32x128xf32> to vector<1x128xf32>
    %33 = arith.addf %31, %32 : vector<1x128xf32>
    %34 = vector.extract_strided_slice %1 {offsets = [5, 0], sizes = [1, 128], strides = [1, 1]} : vector<32x128xf32> to vector<1x128xf32>
    %35 = arith.addf %33, %34 : vector<1x128xf32>
    %36 = vector.extract_strided_slice %1 {offsets = [6, 0], sizes = [1, 128], strides = [1, 1]} : vector<32x128xf32> to vector<1x128xf32>
    %37 = arith.addf %35, %36 : vector<1x128xf32>
    %38 = vector.extract_strided_slice %1 {offsets = [7, 0], sizes = [1, 128], strides = [1, 1]} : vector<32x128xf32> to vector<1x128xf32>
    %39 = arith.addf %37, %38 : vector<1x128xf32>
    %40 = vector.extract_strided_slice %1 {offsets = [8, 0], sizes = [1, 128], strides = [1, 1]} : vector<32x128xf32> to vector<1x128xf32>
    %41 = arith.addf %39, %40 : vector<1x128xf32>
    %42 = vector.extract_strided_slice %1 {offsets = [9, 0], sizes = [1, 128], strides = [1, 1]} : vector<32x128xf32> to vector<1x128xf32>
    %43 = arith.addf %41, %42 : vector<1x128xf32>
    %44 = vector.extract_strided_slice %1 {offsets = [10, 0], sizes = [1, 128], strides = [1, 1]} : vector<32x128xf32> to vector<1x128xf32>
    %45 = arith.addf %43, %44 : vector<1x128xf32>
    %46 = vector.extract_strided_slice %1 {offsets = [11, 0], sizes = [1, 128], strides = [1, 1]} : vector<32x128xf32> to vector<1x128xf32>
    %47 = arith.addf %45, %46 : vector<1x128xf32>
    %48 = vector.extract_strided_slice %1 {offsets = [12, 0], sizes = [1, 128], strides = [1, 1]} : vector<32x128xf32> to vector<1x128xf32>
    %49 = arith.addf %47, %48 : vector<1x128xf32>
    %cst_9 = arith.constant 1.200000e+01 : f32
    %50 = vector.broadcast %cst_9 : f32 to vector<1x128xf32>
    %51 = arith.mulf %50, %24 : vector<1x128xf32>
    %52 = arith.addf %51, %49 : vector<1x128xf32>
    %cst_10 = arith.constant 4.000000e-02 : f32
    %53 = vector.broadcast %cst_10 : f32 to vector<1x128xf32>
    %54 = arith.mulf %52, %53 : vector<1x128xf32>
    %55 = vector.extract_strided_slice %1 {offsets = [0, 0], sizes = [1, 128], strides = [1, 1]} : vector<32x128xf32> to vector<1x128xf32>
    %56 = arith.subf %55, %54 : vector<1x128xf32>
    %57 = vector.extract_strided_slice %1 {offsets = [13, 0], sizes = [1, 128], strides = [1, 1]} : vector<32x128xf32> to vector<1x128xf32>
    %58 = arith.addf %49, %57 : vector<1x128xf32>
    %cst_11 = arith.constant 1.100000e+01 : f32
    %59 = vector.broadcast %cst_11 : f32 to vector<1x128xf32>
    %60 = arith.mulf %59, %24 : vector<1x128xf32>
    %61 = arith.addf %60, %58 : vector<1x128xf32>
    %cst_12 = arith.constant 4.000000e-02 : f32
    %62 = vector.broadcast %cst_12 : f32 to vector<1x128xf32>
    %63 = arith.mulf %61, %62 : vector<1x128xf32>
    %64 = vector.extract_strided_slice %1 {offsets = [1, 0], sizes = [1, 128], strides = [1, 1]} : vector<32x128xf32> to vector<1x128xf32>
    %65 = arith.subf %64, %63 : vector<1x128xf32>
    %66 = vector.extract_strided_slice %1 {offsets = [14, 0], sizes = [1, 128], strides = [1, 1]} : vector<32x128xf32> to vector<1x128xf32>
    %67 = arith.addf %58, %66 : vector<1x128xf32>
    %cst_13 = arith.constant 1.000000e+01 : f32
    %68 = vector.broadcast %cst_13 : f32 to vector<1x128xf32>
    %69 = arith.mulf %68, %24 : vector<1x128xf32>
    %70 = arith.addf %69, %67 : vector<1x128xf32>
    %cst_14 = arith.constant 4.000000e-02 : f32
    %71 = vector.broadcast %cst_14 : f32 to vector<1x128xf32>
    %72 = arith.mulf %70, %71 : vector<1x128xf32>
    %73 = vector.extract_strided_slice %1 {offsets = [2, 0], sizes = [1, 128], strides = [1, 1]} : vector<32x128xf32> to vector<1x128xf32>
    %74 = arith.subf %73, %72 : vector<1x128xf32>
    %75 = vector.extract_strided_slice %1 {offsets = [15, 0], sizes = [1, 128], strides = [1, 1]} : vector<32x128xf32> to vector<1x128xf32>
    %76 = arith.addf %67, %75 : vector<1x128xf32>
    %cst_15 = arith.constant 9.000000e+00 : f32
    %77 = vector.broadcast %cst_15 : f32 to vector<1x128xf32>
    %78 = arith.mulf %77, %24 : vector<1x128xf32>
    %79 = arith.addf %78, %76 : vector<1x128xf32>
    %cst_16 = arith.constant 4.000000e-02 : f32
    %80 = vector.broadcast %cst_16 : f32 to vector<1x128xf32>
    %81 = arith.mulf %79, %80 : vector<1x128xf32>
    %82 = vector.extract_strided_slice %1 {offsets = [3, 0], sizes = [1, 128], strides = [1, 1]} : vector<32x128xf32> to vector<1x128xf32>
    %83 = arith.subf %82, %81 : vector<1x128xf32>
    %84 = vector.extract_strided_slice %1 {offsets = [16, 0], sizes = [1, 128], strides = [1, 1]} : vector<32x128xf32> to vector<1x128xf32>
    %85 = arith.addf %76, %84 : vector<1x128xf32>
    %cst_17 = arith.constant 8.000000e+00 : f32
    %86 = vector.broadcast %cst_17 : f32 to vector<1x128xf32>
    %87 = arith.mulf %86, %24 : vector<1x128xf32>
    %88 = arith.addf %87, %85 : vector<1x128xf32>
    %cst_18 = arith.constant 4.000000e-02 : f32
    %89 = vector.broadcast %cst_18 : f32 to vector<1x128xf32>
    %90 = arith.mulf %88, %89 : vector<1x128xf32>
    %91 = vector.extract_strided_slice %1 {offsets = [4, 0], sizes = [1, 128], strides = [1, 1]} : vector<32x128xf32> to vector<1x128xf32>
    %92 = arith.subf %91, %90 : vector<1x128xf32>
    %93 = vector.extract_strided_slice %1 {offsets = [17, 0], sizes = [1, 128], strides = [1, 1]} : vector<32x128xf32> to vector<1x128xf32>
    %94 = arith.addf %85, %93 : vector<1x128xf32>
    %cst_19 = arith.constant 7.000000e+00 : f32
    %95 = vector.broadcast %cst_19 : f32 to vector<1x128xf32>
    %96 = arith.mulf %95, %24 : vector<1x128xf32>
    %97 = arith.addf %96, %94 : vector<1x128xf32>
    %cst_20 = arith.constant 4.000000e-02 : f32
    %98 = vector.broadcast %cst_20 : f32 to vector<1x128xf32>
    %99 = arith.mulf %97, %98 : vector<1x128xf32>
    %100 = vector.extract_strided_slice %1 {offsets = [5, 0], sizes = [1, 128], strides = [1, 1]} : vector<32x128xf32> to vector<1x128xf32>
    %101 = arith.subf %100, %99 : vector<1x128xf32>
    %102 = vector.extract_strided_slice %1 {offsets = [18, 0], sizes = [1, 128], strides = [1, 1]} : vector<32x128xf32> to vector<1x128xf32>
    %103 = arith.addf %94, %102 : vector<1x128xf32>
    %cst_21 = arith.constant 6.000000e+00 : f32
    %104 = vector.broadcast %cst_21 : f32 to vector<1x128xf32>
    %105 = arith.mulf %104, %24 : vector<1x128xf32>
    %106 = arith.addf %105, %103 : vector<1x128xf32>
    %cst_22 = arith.constant 4.000000e-02 : f32
    %107 = vector.broadcast %cst_22 : f32 to vector<1x128xf32>
    %108 = arith.mulf %106, %107 : vector<1x128xf32>
    %109 = vector.extract_strided_slice %1 {offsets = [6, 0], sizes = [1, 128], strides = [1, 1]} : vector<32x128xf32> to vector<1x128xf32>
    %110 = arith.subf %109, %108 : vector<1x128xf32>
    %111 = vector.extract_strided_slice %1 {offsets = [19, 0], sizes = [1, 128], strides = [1, 1]} : vector<32x128xf32> to vector<1x128xf32>
    %112 = arith.addf %103, %111 : vector<1x128xf32>
    %cst_23 = arith.constant 5.000000e+00 : f32
    %113 = vector.broadcast %cst_23 : f32 to vector<1x128xf32>
    %114 = arith.mulf %113, %24 : vector<1x128xf32>
    %115 = arith.addf %114, %112 : vector<1x128xf32>
    %cst_24 = arith.constant 4.000000e-02 : f32
    %116 = vector.broadcast %cst_24 : f32 to vector<1x128xf32>
    %117 = arith.mulf %115, %116 : vector<1x128xf32>
    %118 = vector.extract_strided_slice %1 {offsets = [7, 0], sizes = [1, 128], strides = [1, 1]} : vector<32x128xf32> to vector<1x128xf32>
    %119 = arith.subf %118, %117 : vector<1x128xf32>
    %120 = vector.extract_strided_slice %1 {offsets = [20, 0], sizes = [1, 128], strides = [1, 1]} : vector<32x128xf32> to vector<1x128xf32>
    %121 = arith.addf %112, %120 : vector<1x128xf32>
    %cst_25 = arith.constant 4.000000e+00 : f32
    %122 = vector.broadcast %cst_25 : f32 to vector<1x128xf32>
    %123 = arith.mulf %122, %24 : vector<1x128xf32>
    %124 = arith.addf %123, %121 : vector<1x128xf32>
    %cst_26 = arith.constant 4.000000e-02 : f32
    %125 = vector.broadcast %cst_26 : f32 to vector<1x128xf32>
    %126 = arith.mulf %124, %125 : vector<1x128xf32>
    %127 = vector.extract_strided_slice %1 {offsets = [8, 0], sizes = [1, 128], strides = [1, 1]} : vector<32x128xf32> to vector<1x128xf32>
    %128 = arith.subf %127, %126 : vector<1x128xf32>
    %129 = vector.extract_strided_slice %1 {offsets = [21, 0], sizes = [1, 128], strides = [1, 1]} : vector<32x128xf32> to vector<1x128xf32>
    %130 = arith.addf %121, %129 : vector<1x128xf32>
    %cst_27 = arith.constant 3.000000e+00 : f32
    %131 = vector.broadcast %cst_27 : f32 to vector<1x128xf32>
    %132 = arith.mulf %131, %24 : vector<1x128xf32>
    %133 = arith.addf %132, %130 : vector<1x128xf32>
    %cst_28 = arith.constant 4.000000e-02 : f32
    %134 = vector.broadcast %cst_28 : f32 to vector<1x128xf32>
    %135 = arith.mulf %133, %134 : vector<1x128xf32>
    %136 = vector.extract_strided_slice %1 {offsets = [9, 0], sizes = [1, 128], strides = [1, 1]} : vector<32x128xf32> to vector<1x128xf32>
    %137 = arith.subf %136, %135 : vector<1x128xf32>
    %138 = vector.extract_strided_slice %1 {offsets = [22, 0], sizes = [1, 128], strides = [1, 1]} : vector<32x128xf32> to vector<1x128xf32>
    %139 = arith.addf %130, %138 : vector<1x128xf32>
    %cst_29 = arith.constant 2.000000e+00 : f32
    %140 = vector.broadcast %cst_29 : f32 to vector<1x128xf32>
    %141 = arith.mulf %140, %24 : vector<1x128xf32>
    %142 = arith.addf %141, %139 : vector<1x128xf32>
    %cst_30 = arith.constant 4.000000e-02 : f32
    %143 = vector.broadcast %cst_30 : f32 to vector<1x128xf32>
    %144 = arith.mulf %142, %143 : vector<1x128xf32>
    %145 = vector.extract_strided_slice %1 {offsets = [10, 0], sizes = [1, 128], strides = [1, 1]} : vector<32x128xf32> to vector<1x128xf32>
    %146 = arith.subf %145, %144 : vector<1x128xf32>
    %147 = vector.extract_strided_slice %1 {offsets = [23, 0], sizes = [1, 128], strides = [1, 1]} : vector<32x128xf32> to vector<1x128xf32>
    %148 = arith.addf %139, %147 : vector<1x128xf32>
    %cst_31 = arith.constant 1.000000e+00 : f32
    %149 = vector.broadcast %cst_31 : f32 to vector<1x128xf32>
    %150 = arith.mulf %149, %24 : vector<1x128xf32>
    %151 = arith.addf %150, %148 : vector<1x128xf32>
    %cst_32 = arith.constant 4.000000e-02 : f32
    %152 = vector.broadcast %cst_32 : f32 to vector<1x128xf32>
    %153 = arith.mulf %151, %152 : vector<1x128xf32>
    %154 = vector.extract_strided_slice %1 {offsets = [11, 0], sizes = [1, 128], strides = [1, 1]} : vector<32x128xf32> to vector<1x128xf32>
    %155 = arith.subf %154, %153 : vector<1x128xf32>
    %156 = tpu.concatenate %54, %63, %72, %81, %90, %99, %108, %117, %126, %135, %144, %153 in 0 : vector<1x128xf32>, vector<1x128xf32>, vector<1x128xf32>, vector<1x128xf32>, vector<1x128xf32>, vector<1x128xf32>, vector<1x128xf32>, vector<1x128xf32>, vector<1x128xf32>, vector<1x128xf32>, vector<1x128xf32>, vector<1x128xf32> -> vector<12x128xf32>
    %157 = tpu.concatenate %56, %65, %74, %83, %92, %101, %110, %119, %128, %137, %146, %155 in 0 : vector<1x128xf32>, vector<1x128xf32>, vector<1x128xf32>, vector<1x128xf32>, vector<1x128xf32>, vector<1x128xf32>, vector<1x128xf32>, vector<1x128xf32>, vector<1x128xf32>, vector<1x128xf32>, vector<1x128xf32>, vector<1x128xf32> -> vector<12x128xf32>
    %c0_33 = arith.constant 0 : index
    %c0_34 = arith.constant 0 : index
    %c0_35 = arith.constant 0 : index
    %158 = vector.load %arg4[%c0_33, %c0_34, %c0_35] : memref<1x32x128xf32, #tpu.memory_space<vmem>>, vector<1x12x128xf32>
    %159 = vector.shape_cast %158 : vector<1x12x128xf32> to vector<12x128xf32>
    %160 = vector.shape_cast %156 : vector<12x128xf32> to vector<1x12x128xf32>
    tpu.vector_store %arg4[%c0_33, %c0_34, %c0_35], %160 {strides = array<i32>} : memref<1x32x128xf32, #tpu.memory_space<vmem>>, vector<1x12x128xf32>,
    %c0_36 = arith.constant 0 : index
    %c0_37 = arith.constant 0 : index
    %c0_38 = arith.constant 0 : index
    %161 = vector.load %arg3[%c0_36, %c0_37, %c0_38] : memref<1x32x128xf32, #tpu.memory_space<vmem>>, vector<1x12x128xf32>
    %162 = vector.shape_cast %161 : vector<1x12x128xf32> to vector<12x128xf32>
    %163 = vector.shape_cast %157 : vector<12x128xf32> to vector<1x12x128xf32>
    tpu.vector_store %arg3[%c0_36, %c0_37, %c0_38], %163 {strides = array<i32>} : memref<1x32x128xf32, #tpu.memory_space<vmem>>, vector<1x12x128xf32>,
    %164 = vector.extract_strided_slice %1 {offsets = [30, 0], sizes = [1, 128], strides = [1, 1]} : vector<32x128xf32> to vector<1x128xf32>
    %165 = arith.addf %25, %164 : vector<1x128xf32>
    %166 = vector.extract_strided_slice %1 {offsets = [29, 0], sizes = [1, 128], strides = [1, 1]} : vector<32x128xf32> to vector<1x128xf32>
    %167 = arith.addf %165, %166 : vector<1x128xf32>
    %168 = vector.extract_strided_slice %1 {offsets = [28, 0], sizes = [1, 128], strides = [1, 1]} : vector<32x128xf32> to vector<1x128xf32>
    %169 = arith.addf %167, %168 : vector<1x128xf32>
    %170 = vector.extract_strided_slice %1 {offsets = [27, 0], sizes = [1, 128], strides = [1, 1]} : vector<32x128xf32> to vector<1x128xf32>
    %171 = arith.addf %169, %170 : vector<1x128xf32>
    %172 = vector.extract_strided_slice %1 {offsets = [26, 0], sizes = [1, 128], strides = [1, 1]} : vector<32x128xf32> to vector<1x128xf32>
    %173 = arith.addf %171, %172 : vector<1x128xf32>
    %174 = vector.extract_strided_slice %1 {offsets = [25, 0], sizes = [1, 128], strides = [1, 1]} : vector<32x128xf32> to vector<1x128xf32>
    %175 = arith.addf %173, %174 : vector<1x128xf32>
    %176 = vector.extract_strided_slice %1 {offsets = [24, 0], sizes = [1, 128], strides = [1, 1]} : vector<32x128xf32> to vector<1x128xf32>
    %177 = arith.addf %175, %176 : vector<1x128xf32>
    %178 = vector.extract_strided_slice %1 {offsets = [23, 0], sizes = [1, 128], strides = [1, 1]} : vector<32x128xf32> to vector<1x128xf32>
    %179 = arith.addf %177, %178 : vector<1x128xf32>
    %180 = vector.extract_strided_slice %1 {offsets = [22, 0], sizes = [1, 128], strides = [1, 1]} : vector<32x128xf32> to vector<1x128xf32>
    %181 = arith.addf %179, %180 : vector<1x128xf32>
    %182 = vector.extract_strided_slice %1 {offsets = [21, 0], sizes = [1, 128], strides = [1, 1]} : vector<32x128xf32> to vector<1x128xf32>
    %183 = arith.addf %181, %182 : vector<1x128xf32>
    %184 = vector.extract_strided_slice %1 {offsets = [20, 0], sizes = [1, 128], strides = [1, 1]} : vector<32x128xf32> to vector<1x128xf32>
    %185 = arith.addf %183, %184 : vector<1x128xf32>
    %186 = vector.extract_strided_slice %1 {offsets = [19, 0], sizes = [1, 128], strides = [1, 1]} : vector<32x128xf32> to vector<1x128xf32>
    %187 = arith.addf %185, %186 : vector<1x128xf32>
    %cst_39 = arith.constant 1.200000e+01 : f32
    %188 = vector.broadcast %cst_39 : f32 to vector<1x128xf32>
    %189 = arith.mulf %188, %25 : vector<1x128xf32>
    %190 = arith.addf %189, %187 : vector<1x128xf32>
    %cst_40 = arith.constant 4.000000e-02 : f32
    %191 = vector.broadcast %cst_40 : f32 to vector<1x128xf32>
    %192 = arith.mulf %190, %191 : vector<1x128xf32>
    %193 = vector.extract_strided_slice %1 {offsets = [31, 0], sizes = [1, 128], strides = [1, 1]} : vector<32x128xf32> to vector<1x128xf32>
    %194 = arith.subf %193, %192 : vector<1x128xf32>
    %195 = vector.extract_strided_slice %1 {offsets = [18, 0], sizes = [1, 128], strides = [1, 1]} : vector<32x128xf32> to vector<1x128xf32>
    %196 = arith.addf %187, %195 : vector<1x128xf32>
    %cst_41 = arith.constant 1.100000e+01 : f32
    %197 = vector.broadcast %cst_41 : f32 to vector<1x128xf32>
    %198 = arith.mulf %197, %25 : vector<1x128xf32>
    %199 = arith.addf %198, %196 : vector<1x128xf32>
    %cst_42 = arith.constant 4.000000e-02 : f32
    %200 = vector.broadcast %cst_42 : f32 to vector<1x128xf32>
    %201 = arith.mulf %199, %200 : vector<1x128xf32>
    %202 = vector.extract_strided_slice %1 {offsets = [30, 0], sizes = [1, 128], strides = [1, 1]} : vector<32x128xf32> to vector<1x128xf32>
    %203 = arith.subf %202, %201 : vector<1x128xf32>
    %204 = vector.extract_strided_slice %1 {offsets = [17, 0], sizes = [1, 128], strides = [1, 1]} : vector<32x128xf32> to vector<1x128xf32>
    %205 = arith.addf %196, %204 : vector<1x128xf32>
    %cst_43 = arith.constant 1.000000e+01 : f32
    %206 = vector.broadcast %cst_43 : f32 to vector<1x128xf32>
    %207 = arith.mulf %206, %25 : vector<1x128xf32>
    %208 = arith.addf %207, %205 : vector<1x128xf32>
    %cst_44 = arith.constant 4.000000e-02 : f32
    %209 = vector.broadcast %cst_44 : f32 to vector<1x128xf32>
    %210 = arith.mulf %208, %209 : vector<1x128xf32>
    %211 = vector.extract_strided_slice %1 {offsets = [29, 0], sizes = [1, 128], strides = [1, 1]} : vector<32x128xf32> to vector<1x128xf32>
    %212 = arith.subf %211, %210 : vector<1x128xf32>
    %213 = vector.extract_strided_slice %1 {offsets = [16, 0], sizes = [1, 128], strides = [1, 1]} : vector<32x128xf32> to vector<1x128xf32>
    %214 = arith.addf %205, %213 : vector<1x128xf32>
    %cst_45 = arith.constant 9.000000e+00 : f32
    %215 = vector.broadcast %cst_45 : f32 to vector<1x128xf32>
    %216 = arith.mulf %215, %25 : vector<1x128xf32>
    %217 = arith.addf %216, %214 : vector<1x128xf32>
    %cst_46 = arith.constant 4.000000e-02 : f32
    %218 = vector.broadcast %cst_46 : f32 to vector<1x128xf32>
    %219 = arith.mulf %217, %218 : vector<1x128xf32>
    %220 = vector.extract_strided_slice %1 {offsets = [28, 0], sizes = [1, 128], strides = [1, 1]} : vector<32x128xf32> to vector<1x128xf32>
    %221 = arith.subf %220, %219 : vector<1x128xf32>
    %222 = vector.extract_strided_slice %1 {offsets = [15, 0], sizes = [1, 128], strides = [1, 1]} : vector<32x128xf32> to vector<1x128xf32>
    %223 = arith.addf %214, %222 : vector<1x128xf32>
    %cst_47 = arith.constant 8.000000e+00 : f32
    %224 = vector.broadcast %cst_47 : f32 to vector<1x128xf32>
    %225 = arith.mulf %224, %25 : vector<1x128xf32>
    %226 = arith.addf %225, %223 : vector<1x128xf32>
    %cst_48 = arith.constant 4.000000e-02 : f32
    %227 = vector.broadcast %cst_48 : f32 to vector<1x128xf32>
    %228 = arith.mulf %226, %227 : vector<1x128xf32>
    %229 = vector.extract_strided_slice %1 {offsets = [27, 0], sizes = [1, 128], strides = [1, 1]} : vector<32x128xf32> to vector<1x128xf32>
    %230 = arith.subf %229, %228 : vector<1x128xf32>
    %231 = vector.extract_strided_slice %1 {offsets = [14, 0], sizes = [1, 128], strides = [1, 1]} : vector<32x128xf32> to vector<1x128xf32>
    %232 = arith.addf %223, %231 : vector<1x128xf32>
    %cst_49 = arith.constant 7.000000e+00 : f32
    %233 = vector.broadcast %cst_49 : f32 to vector<1x128xf32>
    %234 = arith.mulf %233, %25 : vector<1x128xf32>
    %235 = arith.addf %234, %232 : vector<1x128xf32>
    %cst_50 = arith.constant 4.000000e-02 : f32
    %236 = vector.broadcast %cst_50 : f32 to vector<1x128xf32>
    %237 = arith.mulf %235, %236 : vector<1x128xf32>
    %238 = vector.extract_strided_slice %1 {offsets = [26, 0], sizes = [1, 128], strides = [1, 1]} : vector<32x128xf32> to vector<1x128xf32>
    %239 = arith.subf %238, %237 : vector<1x128xf32>
    %240 = vector.extract_strided_slice %1 {offsets = [13, 0], sizes = [1, 128], strides = [1, 1]} : vector<32x128xf32> to vector<1x128xf32>
    %241 = arith.addf %232, %240 : vector<1x128xf32>
    %cst_51 = arith.constant 6.000000e+00 : f32
    %242 = vector.broadcast %cst_51 : f32 to vector<1x128xf32>
    %243 = arith.mulf %242, %25 : vector<1x128xf32>
    %244 = arith.addf %243, %241 : vector<1x128xf32>
    %cst_52 = arith.constant 4.000000e-02 : f32
    %245 = vector.broadcast %cst_52 : f32 to vector<1x128xf32>
    %246 = arith.mulf %244, %245 : vector<1x128xf32>
    %247 = vector.extract_strided_slice %1 {offsets = [25, 0], sizes = [1, 128], strides = [1, 1]} : vector<32x128xf32> to vector<1x128xf32>
    %248 = arith.subf %247, %246 : vector<1x128xf32>
    %249 = vector.extract_strided_slice %1 {offsets = [12, 0], sizes = [1, 128], strides = [1, 1]} : vector<32x128xf32> to vector<1x128xf32>
    %250 = arith.addf %241, %249 : vector<1x128xf32>
    %cst_53 = arith.constant 5.000000e+00 : f32
    %251 = vector.broadcast %cst_53 : f32 to vector<1x128xf32>
    %252 = arith.mulf %251, %25 : vector<1x128xf32>
    %253 = arith.addf %252, %250 : vector<1x128xf32>
    %cst_54 = arith.constant 4.000000e-02 : f32
    %254 = vector.broadcast %cst_54 : f32 to vector<1x128xf32>
    %255 = arith.mulf %253, %254 : vector<1x128xf32>
    %256 = vector.extract_strided_slice %1 {offsets = [24, 0], sizes = [1, 128], strides = [1, 1]} : vector<32x128xf32> to vector<1x128xf32>
    %257 = arith.subf %256, %255 : vector<1x128xf32>
    %258 = vector.extract_strided_slice %1 {offsets = [11, 0], sizes = [1, 128], strides = [1, 1]} : vector<32x128xf32> to vector<1x128xf32>
    %259 = arith.addf %250, %258 : vector<1x128xf32>
    %cst_55 = arith.constant 4.000000e+00 : f32
    %260 = vector.broadcast %cst_55 : f32 to vector<1x128xf32>
    %261 = arith.mulf %260, %25 : vector<1x128xf32>
    %262 = arith.addf %261, %259 : vector<1x128xf32>
    %cst_56 = arith.constant 4.000000e-02 : f32
    %263 = vector.broadcast %cst_56 : f32 to vector<1x128xf32>
    %264 = arith.mulf %262, %263 : vector<1x128xf32>
    %265 = vector.extract_strided_slice %1 {offsets = [23, 0], sizes = [1, 128], strides = [1, 1]} : vector<32x128xf32> to vector<1x128xf32>
    %266 = arith.subf %265, %264 : vector<1x128xf32>
    %267 = vector.extract_strided_slice %1 {offsets = [10, 0], sizes = [1, 128], strides = [1, 1]} : vector<32x128xf32> to vector<1x128xf32>
    %268 = arith.addf %259, %267 : vector<1x128xf32>
    %cst_57 = arith.constant 3.000000e+00 : f32
    %269 = vector.broadcast %cst_57 : f32 to vector<1x128xf32>
    %270 = arith.mulf %269, %25 : vector<1x128xf32>
    %271 = arith.addf %270, %268 : vector<1x128xf32>
    %cst_58 = arith.constant 4.000000e-02 : f32
    %272 = vector.broadcast %cst_58 : f32 to vector<1x128xf32>
    %273 = arith.mulf %271, %272 : vector<1x128xf32>
    %274 = vector.extract_strided_slice %1 {offsets = [22, 0], sizes = [1, 128], strides = [1, 1]} : vector<32x128xf32> to vector<1x128xf32>
    %275 = arith.subf %274, %273 : vector<1x128xf32>
    %276 = vector.extract_strided_slice %1 {offsets = [9, 0], sizes = [1, 128], strides = [1, 1]} : vector<32x128xf32> to vector<1x128xf32>
    %277 = arith.addf %268, %276 : vector<1x128xf32>
    %cst_59 = arith.constant 2.000000e+00 : f32
    %278 = vector.broadcast %cst_59 : f32 to vector<1x128xf32>
    %279 = arith.mulf %278, %25 : vector<1x128xf32>
    %280 = arith.addf %279, %277 : vector<1x128xf32>
    %cst_60 = arith.constant 4.000000e-02 : f32
    %281 = vector.broadcast %cst_60 : f32 to vector<1x128xf32>
    %282 = arith.mulf %280, %281 : vector<1x128xf32>
    %283 = vector.extract_strided_slice %1 {offsets = [21, 0], sizes = [1, 128], strides = [1, 1]} : vector<32x128xf32> to vector<1x128xf32>
    %284 = arith.subf %283, %282 : vector<1x128xf32>
    %285 = vector.extract_strided_slice %1 {offsets = [8, 0], sizes = [1, 128], strides = [1, 1]} : vector<32x128xf32> to vector<1x128xf32>
    %286 = arith.addf %277, %285 : vector<1x128xf32>
    %cst_61 = arith.constant 1.000000e+00 : f32
    %287 = vector.broadcast %cst_61 : f32 to vector<1x128xf32>
    %288 = arith.mulf %287, %25 : vector<1x128xf32>
    %289 = arith.addf %288, %286 : vector<1x128xf32>
    %cst_62 = arith.constant 4.000000e-02 : f32
    %290 = vector.broadcast %cst_62 : f32 to vector<1x128xf32>
    %291 = arith.mulf %289, %290 : vector<1x128xf32>
    %292 = vector.extract_strided_slice %1 {offsets = [20, 0], sizes = [1, 128], strides = [1, 1]} : vector<32x128xf32> to vector<1x128xf32>
    %293 = arith.subf %292, %291 : vector<1x128xf32>
    %294 = tpu.concatenate %291, %282, %273, %264, %255, %246, %237, %228, %219, %210, %201, %192 in 0 : vector<1x128xf32>, vector<1x128xf32>, vector<1x128xf32>, vector<1x128xf32>, vector<1x128xf32>, vector<1x128xf32>, vector<1x128xf32>, vector<1x128xf32>, vector<1x128xf32>, vector<1x128xf32>, vector<1x128xf32>, vector<1x128xf32> -> vector<12x128xf32>
    %295 = tpu.concatenate %293, %284, %275, %266, %257, %248, %239, %230, %221, %212, %203, %194 in 0 : vector<1x128xf32>, vector<1x128xf32>, vector<1x128xf32>, vector<1x128xf32>, vector<1x128xf32>, vector<1x128xf32>, vector<1x128xf32>, vector<1x128xf32>, vector<1x128xf32>, vector<1x128xf32>, vector<1x128xf32>, vector<1x128xf32> -> vector<12x128xf32>
    %c0_63 = arith.constant 0 : index
    %c20 = arith.constant 20 : index
    %c0_64 = arith.constant 0 : index
    %296 = vector.load %arg4[%c0_63, %c20, %c0_64] : memref<1x32x128xf32, #tpu.memory_space<vmem>>, vector<1x12x128xf32>
    %297 = vector.shape_cast %296 : vector<1x12x128xf32> to vector<12x128xf32>
    %298 = vector.shape_cast %294 : vector<12x128xf32> to vector<1x12x128xf32>
    tpu.vector_store %arg4[%c0_63, %c20, %c0_64], %298 {strides = array<i32>} : memref<1x32x128xf32, #tpu.memory_space<vmem>>, vector<1x12x128xf32>,
    %c0_65 = arith.constant 0 : index
    %c20_66 = arith.constant 20 : index
    %c0_67 = arith.constant 0 : index
    %299 = vector.load %arg3[%c0_65, %c20_66, %c0_67] : memref<1x32x128xf32, #tpu.memory_space<vmem>>, vector<1x12x128xf32>
    %300 = vector.shape_cast %299 : vector<1x12x128xf32> to vector<12x128xf32>
    %301 = vector.shape_cast %295 : vector<12x128xf32> to vector<1x12x128xf32>
    tpu.vector_store %arg3[%c0_65, %c20_66, %c0_67], %301 {strides = array<i32>} : memref<1x32x128xf32, #tpu.memory_space<vmem>>, vector<1x12x128xf32>,
    return
  }
  func.func @transform_0(%arg0: i32, %arg1: i32) -> (i32, i32, i32) {
    %c0_i32 = arith.constant 0 : i32
    %c0_i32_0 = arith.constant 0 : i32
    return %arg0, %c0_i32, %arg1 : i32, i32, i32
  }
  func.func @transform_1(%arg0: i32, %arg1: i32) -> (i32, i32, i32) {
    %c0_i32 = arith.constant 0 : i32
    %c0_i32_0 = arith.constant 0 : i32
    return %arg0, %c0_i32, %arg1 : i32, i32, i32
  }
  func.func @transform_2(%arg0: i32, %arg1: i32) -> (i32, i32, i32) {
    %c0_i32 = arith.constant 0 : i32
    %c0_i32_0 = arith.constant 0 : i32
    return %arg0, %c0_i32, %arg1 : i32, i32, i32
  }
}

</mosaic_0001>

<bundles_post_ra>
// kernel: tpu_custom_call.1
= control target key start
LH: loop header
LB: loop body
LE: loop exit
PB: predicated region body
PF: predicated region fallthrough
CT: control target
= control target key end

     0   :  { %8 = vsyncpa [#allocation3], 0  ;;  %s913_s0 = inlined_call_operand.hbm [shape: f32[1,32,128], index: 0, kind: input, shape index: {}]   ;;  %s914_s1 = inlined_call_operand.hbm [shape: f32[1,32,128], index: 1, kind: output, shape index: {0}]   ;;  %s915_s2 = inlined_call_operand.hbm [shape: f32[1,32,128], index: 2, kind: output, shape index: {1}]  }
   0x1   :  { %9 = vsyncpa [#allocation4], 0 }
   0x2   :  { %10 = vsyncpa [#allocation7], 0  ;;  %s608_s9 = smov [#allocation2]   ;;  %s536_s13 = scalar_lea.hbm %s913_s0, 512 }
   0x3   :  { %s16_s10 = sshll.u32 %s608_s9, 4  ;;  %p537_p0 = scmp.ne.s32.totalorder %s913_s0, %s536_s13  ;;  %s17_s10 = int_to_ptr.vmem [resolvable:$true] %s16_s10 }
   0x4   :  { %p540_p1 = scmp.lt.u32.totalorder %s536_s13, %s913_s0 }
   0x6   :  { %p542_p2 = pnand %p540_p1, %p537_p0 }
   0x8   :  { %545 = shalt.err (!%p542_p2)
}
   0x9   :  { %s546_s18 = scalar_lea.vmem %s17_s10, 512  ;;  %p551_p4 = scmp.lt.s32.totalorder %s17_s10, %s17_s10 }
   0xa   :  { %p547_p3 = scmp.ne.s32.totalorder %s17_s10, %s546_s18  ;;  %p552_p5 = scmp.lt.s32.totalorder %s546_s18, %s546_s18 }
   0xc   :  { %p553_p6 = por %p552_p5, %p551_p4 }
   0xe   :  { %p554_p7 = pnand %p553_p6, %p547_p3 }
  0x10   :  { %557 = shalt.err (!%p554_p7)
}
  0x11   :  { %s609_s19 = smov 128   ;;  %s610_s20 = smov 8  }
  0x12   :  { %22 = dma.hbm_to_vmem [thread:$0]  %s913_s0, 512, %s17_s10, [#allocation3], %s609_s19, %s609_s19, %s610_s20  }
  0x13   :  { %602 = dma.done.wait [#allocation3], 512  }
  0x14   :  { %603 = vsyncadd [#allocation3], 4294966784  ;;  %v34_v0 = vlaneseq  ;;  %v645_v2 = vld [vmem:[#allocation2] sm:$0xff]  ;;  %v647_v3 = vld [vmem:[#allocation2 + $0x8] sm:$0xff]  ;;  %vm268_vm3 = vcmask 1040384   ;;  %vm270_vm4 = vcmask 1041408  }
  0x15   :  { %v649_v4 = vld [vmem:[#allocation2 + $0x10] sm:$0xff]  ;;  %v652_v5 = vld [vmem:[#allocation2 + $0x18] sm:$0xff]  ;;  %v30_v6 = vrot.slane %v645_v2, 7  ;;  %v656_v7 = vrot.slane %v647_v3, 7  ;;  %v124_v9 = vrot.slane %v645_v2, 1  ;;  %v127_v11 = vrot.slane %v645_v2, 2 }
  0x16   :  { %v643_v1 = vshrl.u32 %v34_v0, 7  ;;  %v659_v8 = vrot.slane %v649_v4, 7  ;;  %v33_v10 = vrot.slane %v652_v5, 7  ;;  %v130_v15 = vrot.slane %v645_v2, 3  ;;  %s611_s0 = smov [#allocation6]   ;;  %s612_s24 = smov [#allocation5]  }
  0x17   :  { %v126_v14 = vadd.f32 %v124_v9, %v645_v2  ;;  %v133_v25 = vrot.slane %v645_v2, 4  ;;  %v136_v30 = vrot.slane %v645_v2, 5  ;;  %v139_v40 = vrot.slane %v645_v2, 6  ;;  %s515_s23 = sshll.u32 %s611_s0, 4  ;;  %s503_s25 = sshll.u32 %s612_s24, 4  ;;  %s516_s23 = int_to_ptr.vmem [resolvable:$true] %s515_s23  ;;  %s504_s25 = int_to_ptr.vmem [resolvable:$true] %s503_s25 }
  0x18   :  { %vm36_vm0 = vcmp.lt.s32.totalorder %v643_v1, 1  ;;  %vm49_vm1 = vcmp.lt.s32.totalorder %v643_v1, 2  ;;  %vm62_vm2 = vcmp.lt.s32.totalorder %v643_v1, 4  ;;  %v302_v45 = vadd.f32 %v33_v10, %v652_v5  ;;  %s558_s26 = scalar_lea.vmem %s516_s23, 512  ;;  %p563_p9 = scmp.lt.s32.totalorder %s516_s23, %s516_s23 }
  0x19   :  { %v38_v12 = vsel %vm36_vm0, %v656_v7, %v659_v8  ;;  %v39_v13 = vsel %vm36_vm0, %v30_v6, %v656_v7  ;;  %v37_v16 = vsel %vm36_vm0, %v659_v8, %v33_v10  ;;  %v40_v17 = vsel %vm36_vm0, %v33_v10, %v30_v6  ;;  %p559_p8 = scmp.ne.s32.totalorder %s516_s23, %s558_s26  ;;  %p564_p10 = scmp.lt.s32.totalorder %s558_s26, %s558_s26 }
  0x1a   :  { %v42_v18 = vadd.f32 %v39_v13, %v647_v3  ;;  %v43_v19 = vadd.f32 %v38_v12, %v649_v4  ;;  %v41_v20 = vadd.f32 %v40_v17, %v645_v2  ;;  %v44_v21 = vadd.f32 %v37_v16, %v652_v5 }
  0x1b   :  { %v129_v22 = vadd.f32 %v127_v11, %v126_v14  ;;  %v303_v55 = vrot.slane %v652_v5, 6  ;;  %v147_v56 = vrot.slane %v647_v3, 1  ;;  %v150_v57 = vrot.slane %v647_v3, 2  ;;  %p565_p11 = por %p564_p10, %p563_p9 }
  0x1c   :  { %v46_v23 = vrot.slane %v42_v18, 6  ;;  %v47_v24 = vrot.slane %v43_v19, 6  ;;  %v45_v26 = vrot.slane %v41_v20, 6  ;;  %v48_v27 = vrot.slane %v44_v21, 6 }
  0x1d   :  { %v132_v28 = vadd.f32 %v130_v15, %v129_v22  ;;  %vm272_vm5 = vcmask 1042432   ;;  %vm274_vm6 = vcmask 1043456   ;;  %vm276_vm7 = vcmask 1044480   ;;  %p566_p12 = pnand %p565_p11, %p559_p8 }
  0x1e   :  { %v51_v29 = vsel %vm49_vm1, %v46_v23, %v47_v24  ;;  %v50_v31 = vsel %vm49_vm1, %v47_v24, %v48_v27  ;;  %v52_v32 = vsel %vm49_vm1, %v45_v26, %v46_v23  ;;  %v53_v33 = vsel %vm49_vm1, %v48_v27, %v45_v26 }
  0x1f   :  { %v56_v34 = vadd.f32 %v51_v29, %v43_v19  ;;  %v54_v35 = vadd.f32 %v53_v33, %v41_v20  ;;  %v55_v36 = vadd.f32 %v52_v32, %v42_v18  ;;  %v57_v37 = vadd.f32 %v50_v31, %v44_v21 }
  0x20   :  { %v135_v38 = vadd.f32 %v133_v25, %v132_v28  ;;  %v153_v32 = vrot.slane %v647_v3, 3  ;;  %vm278_vm8 = vcmask 1045504   ;;  %vm280_vm9 = vcmask 1046528  }
  0x21   :  { %v60_v39 = vrot.slane %v56_v34, 4  ;;  %v58_v41 = vrot.slane %v54_v35, 4  ;;  %v59_v42 = vrot.slane %v55_v36, 4  ;;  %v61_v43 = vrot.slane %v57_v37, 4 }
  0x22   :  { %v138_v44 = vadd.f32 %v136_v30, %v135_v38 }
  0x23   :  { %v63_v46 = vsel %vm62_vm2, %v60_v39, %v61_v43  ;;  %v64_v47 = vsel %vm62_vm2, %v59_v42, %v60_v39  ;;  %v65_v48 = vsel %vm62_vm2, %v58_v41, %v59_v42  ;;  %v66_v49 = vsel %vm62_vm2, %v61_v43, %v58_v41 }
  0x24   :  { %v67_v50 = vadd.f32 %v66_v49, %v54_v35  ;;  %v68_v51 = vadd.f32 %v65_v48, %v55_v36  ;;  %v69_v52 = vadd.f32 %v64_v47, %v56_v34  ;;  %v70_v53 = vadd.f32 %v63_v46, %v57_v37 }
  0x25   :  { %v141_v54 = vadd.f32 %v139_v40, %v138_v44  ;;  %v305_v35 = vadd.f32 %v303_v55, %v302_v45  ;;  %v156_v36 = vrot.slane %v647_v3, 4  ;;  %v159_v40 = vmul.f32 12.0, %v645_v2 }
  0x26   :  { %v71_v58 = vrot.slane %v67_v50, 7  ;;  %v72_v59 = vrot.slane %v68_v51, 7  ;;  %v73_v60 = vrot.slane %v69_v52, 7  ;;  %v83_v61 = vadd.f32 %v70_v53, %v67_v50 }
  0x27   :  { %v84_v62 = vadd.f32 %v68_v51, %v67_v50  ;;  %v86_v63 = vadd.f32 %v70_v53, %v69_v52  ;;  %v144_v0 = vadd.f32 %v141_v54, %v30_v6  ;;  %v74_v9 = vrot.slane %v70_v53, 7 }
  0x28   :  { %v76_v10 = vsel %vm36_vm0, %v72_v59, %v73_v60  ;;  %v77_v11 = vsel %vm36_vm0, %v71_v58, %v72_v59  ;;  %v87_v12 = vrot.slane %v83_v61, 7  ;;  %v85_v13 = vadd.f32 %v69_v52, %v68_v51 }
  0x29   :  { %v80_v14 = vadd.f32 %v77_v11, %v647_v3  ;;  %v81_v15 = vadd.f32 %v76_v10, %v649_v4  ;;  %v88_v16 = vrot.slane %v84_v62, 7  ;;  %v90_v17 = vrot.slane %v86_v63, 7 }
  0x2a   :  { %v75_v18 = vsel %vm36_vm0, %v73_v60, %v74_v9  ;;  %v89_v19 = vrot.slane %v85_v13, 7  ;;  %v78_v6 = vsel %vm36_vm0, %v74_v9, %v71_v58  ;;  %v145_v20 = vadd.f32 %v144_v0, %v647_v3 }
  0x2b   :  { %v93_v21 = vsel %vm36_vm0, %v87_v12, %v88_v16  ;;  %v94_v22 = vsel %vm36_vm0, %v90_v17, %v87_v12  ;;  %v82_v23 = vadd.f32 %v75_v18, %v652_v5  ;;  %v79_v24 = vadd.f32 %v78_v6, %v645_v2 }
  0x2c   :  { %v96_v25 = vadd.f32 %v94_v22, %v80_v14  ;;  %v97_v26 = vadd.f32 %v93_v21, %v81_v15  ;;  %v92_v27 = vsel %vm36_vm0, %v88_v16, %v89_v19  ;;  %v91_v28 = vsel %vm36_vm0, %v89_v19, %v90_v17 }
  0x2d   :  { %v98_v29 = vadd.f32 %v92_v27, %v82_v23  ;;  %v95_v30 = vadd.f32 %v91_v28, %v79_v24  ;;  %v149_v31 = vadd.f32 %v147_v56, %v145_v20  ;;  %v163_v41 = vrot.slane %v647_v3, 5 }
  0x2e   :  { %v100_v33 = vrot.slane %v96_v25, 4  ;;  %v101_v34 = vrot.slane %v97_v26, 4  ;;  %v166_v42 = vmul.f32 11.0, %v645_v2  ;;  %v173_v43 = vrot.slane %v647_v3, 6 }
  0x2f   :  { %v102_v37 = vrot.slane %v98_v29, 4  ;;  %v99_v38 = vrot.slane %v95_v30, 4  ;;  %v152_v39 = vadd.f32 %v150_v57, %v149_v31  ;;  %v306_v44 = vrot.slane %v652_v5, 5 }
  0x30   :  { %v176_v54 = vmul.f32 10.0, %v645_v2  ;;  %v309_v55 = vrot.slane %v652_v5, 4  ;;  %v312_v58 = vrot.slane %v652_v5, 3  ;;  %v186_v61 = vmul.f32 9.0, %v645_v2 }
  0x31   :  { %v103_v45 = vsel %vm62_vm2, %v101_v34, %v102_v37  ;;  %v106_v46 = vsel %vm62_vm2, %v102_v37, %v99_v38  ;;  %v105_v47 = vsel %vm62_vm2, %v99_v38, %v100_v33  ;;  %v155_v48 = vadd.f32 %v153_v32, %v152_v39 }
  0x32   :  { %v108_v49 = vmul.f32 0.04, %v103_v45  ;;  %v109_v50 = vmul.f32 0.04, %v106_v46  ;;  %v110_v51 = vmul.f32 0.04, %v105_v47  ;;  %v308_v52 = vadd.f32 %v306_v44, %v305_v35 }
  0x33   :  { %v158_v53 = vadd.f32 %v156_v36, %v155_v48  ;;  %v315_v9 = vrot.slane %v652_v5, 2  ;;  %v194_v10 = vmul.f32 8.0, %v645_v2  ;;  %v202_v11 = vrot.slane %v649_v4, 1 }
  0x34   :  { %112 = vst [vmem:[#allocation6 + $0x8] sm:$0xff] %v108_v49  ;;  %113 = vst [vmem:[#allocation6 + $0x10] sm:$0xff] %v109_v50  ;;  %v116_v1 = vsub.f32 %v647_v3, %v108_v49  ;;  %v117_v59 = vsub.f32 %v649_v4, %v109_v50  ;;  %v118_v60 = vsub.f32 %v652_v5, %v110_v51  ;;  %v205_v12 = vmul.f32 7.0, %v645_v2 }
  0x35   :  { %114 = vst [vmem:[#allocation6 + $0x18] sm:$0xff] %v110_v51  ;;  %v160_v62 = vadd.f32 %v159_v40, %v158_v53  ;;  %v165_v63 = vadd.f32 %v163_v41, %v158_v53  ;;  %v311_v0 = vadd.f32 %v309_v55, %v308_v52  ;;  %v212_v13 = vrot.slane %v649_v4, 2 }
  0x36   :  { %120 = vst [vmem:[#allocation5 + $0x8] sm:$0xff] %v116_v1  ;;  %121 = vst [vmem:[#allocation5 + $0x10] sm:$0xff] %v117_v59  ;;  %v215_v16 = vmul.f32 6.0, %v645_v2  ;;  %v222_v19 = vrot.slane %v649_v4, 3  ;;  %v225_v6 = vmul.f32 5.0, %v645_v2  ;;  %v318_v20 = vrot.slane %v652_v5, 1 }
  0x37   :  { %122 = vst [vmem:[#allocation5 + $0x18] sm:$0xff] %v118_v60  ;;  %v167_v14 = vadd.f32 %v166_v42, %v165_v63  ;;  %v175_v15 = vadd.f32 %v173_v43, %v165_v63  ;;  %v314_v17 = vadd.f32 %v312_v58, %v311_v0  ;;  %v161_v18 = vmul.f32 0.04, %v160_v62 }
  0x38   :  { %v232_v25 = vrot.slane %v649_v4, 4  ;;  %v239_v26 = vrot.slane %v649_v4, 5  ;;  %v249_v27 = vrot.slane %v649_v4, 6  ;;  %v235_v28 = vmul.f32 4.0, %v645_v2 }
  0x39   :  { %v168_v21 = vmul.f32 0.04, %v167_v14  ;;  %v177_v22 = vadd.f32 %v176_v54, %v175_v15  ;;  %v185_v23 = vadd.f32 %v175_v15, %v656_v7  ;;  %v317_v24 = vadd.f32 %v315_v9, %v314_v17 }
  0x3a   :  { %v242_v35 = vmul.f32 3.0, %v645_v2  ;;  %v252_v37 = vmul.f32 2.0, %v645_v2  ;;  %v162_v38 = vsub.f32 %v645_v2, %v161_v18  ;;  %v331_v48 = vmul.f32 11.0, %v652_v5 }
  0x3b   :  { %v170_v29 = vrot.slane %v168_v21, 7  ;;  %v178_v30 = vmul.f32 0.04, %v177_v22  ;;  %v187_v31 = vadd.f32 %v186_v61, %v185_v23  ;;  %v193_v33 = vadd.f32 %v185_v23, %v649_v4 }
  0x3c   :  { %v320_v34 = vadd.f32 %v318_v20, %v317_v24 }
  0x3d   :  { %v180_v39 = vrot.slane %v178_v30, 6  ;;  %v188_v40 = vmul.f32 0.04, %v187_v31  ;;  %v195_v42 = vadd.f32 %v194_v10, %v193_v33  ;;  %v204_v44 = vadd.f32 %v202_v11, %v193_v33 }
  0x3e   :  { %v269_v45 = vsel %vm268_vm3, %v161_v18, %v170_v29  ;;  %v321_v46 = vadd.f32 %v320_v34, %v649_v4  ;;  %v172_v47 = vsub.f32 %v645_v2, %v170_v29 }
  0x3f   :  { %v190_v49 = vrot.slane %v188_v40, 5  ;;  %v196_v50 = vmul.f32 0.04, %v195_v42  ;;  %v206_v51 = vadd.f32 %v205_v12, %v204_v44  ;;  %v214_v52 = vadd.f32 %v212_v13, %v204_v44 }
  0x40   :  { %v271_v53 = vsel %vm270_vm4, %v269_v45, %v180_v39  ;;  %v322_v54 = vadd.f32 %v321_v46, %v659_v8  ;;  %v182_v55 = vsub.f32 %v645_v2, %v180_v39  ;;  %v285_v58 = vsel %vm268_vm3, %v162_v38, %v172_v47 }
  0x41   :  { %v198_v1 = vrot.slane %v196_v50, 4  ;;  %v207_v59 = vmul.f32 0.04, %v206_v51  ;;  %v216_v60 = vadd.f32 %v215_v16, %v214_v52  ;;  %v224_v61 = vadd.f32 %v222_v19, %v214_v52 }
  0x42   :  { %v273_v62 = vsel %vm272_vm5, %v271_v53, %v190_v49  ;;  %v323_v63 = vadd.f32 %v322_v54, %v249_v27  ;;  %v192_v0 = vsub.f32 %v645_v2, %v190_v49  ;;  %v286_v9 = vsel %vm270_vm4, %v285_v58, %v182_v55 }
  0x43   :  { %v209_v10 = vrot.slane %v207_v59, 3  ;;  %v217_v12 = vmul.f32 0.04, %v216_v60  ;;  %v226_v14 = vadd.f32 %v225_v6, %v224_v61  ;;  %v234_v15 = vadd.f32 %v232_v25, %v224_v61 }
  0x44   :  { %v275_v17 = vsel %vm274_vm6, %v273_v62, %v198_v1  ;;  %v324_v18 = vadd.f32 %v323_v63, %v239_v26  ;;  %v200_v20 = vsub.f32 %v645_v2, %v198_v1  ;;  %v287_v16 = vsel %vm272_vm5, %v286_v9, %v192_v0 }
  0x45   :  { %v219_v21 = vrot.slane %v217_v12, 2  ;;  %v227_v22 = vmul.f32 0.04, %v226_v14  ;;  %v277_v23 = vsel %vm276_vm7, %v275_v17, %v209_v10  ;;  %v236_v24 = vadd.f32 %v235_v28, %v234_v15 }
  0x46   :  { %v325_v29 = vadd.f32 %v324_v18, %v232_v25  ;;  %v241_v30 = vadd.f32 %v239_v26, %v234_v15  ;;  %v211_v31 = vsub.f32 %v645_v2, %v209_v10  ;;  %v288_v33 = vsel %vm274_vm6, %v287_v16, %v200_v20 }
  0x47   :  { %v229_v6 = vrot.slane %v227_v22, 1  ;;  %v279_v34 = vsel %vm278_vm8, %v277_v23, %v219_v21  ;;  %v237_v38 = vmul.f32 0.04, %v236_v24  ;;  %v221_v39 = vsub.f32 %v645_v2, %v219_v21 }
  0x48   :  { %v330_v40 = vadd.f32 %v325_v29, %v222_v19  ;;  %v243_v42 = vadd.f32 %v242_v35, %v241_v30  ;;  %v251_v44 = vadd.f32 %v249_v27, %v241_v30  ;;  %v289_v45 = vsel %vm276_vm7, %v288_v33, %v211_v31 }
  0x49   :  { %v281_v25 = vsel %vm280_vm9, %v279_v34, %v229_v6  ;;  %v231_v26 = vsub.f32 %v645_v2, %v229_v6  ;;  %v290_v28 = vsel %vm278_vm8, %v289_v45, %v221_v39  ;;  %v339_v46 = vmul.f32 10.0, %v652_v5 }
  0x4a   :  { %295 = vst [vmem:[#allocation6] sm:$0xff] %v281_v25  ;;  %v244_v47 = vmul.f32 0.04, %v243_v42  ;;  %v253_v49 = vadd.f32 %v252_v37, %v251_v44  ;;  %v261_v50 = vadd.f32 %v251_v44, %v659_v8  ;;  %v338_v19 = vadd.f32 %v330_v40, %v212_v13 }
  0x4b   :  { %v291_v27 = vsel %vm280_vm9, %v290_v28, %v231_v26  ;;  %v238_v35 = vsub.f32 %v647_v3, %v237_v38  ;;  %v326_v51 = vmul.f32 12.0, %v652_v5  ;;  %v347_v52 = vmul.f32 9.0, %v652_v5 }
  0x4c   :  { %v246_v53 = vrot.slane %v244_v47, 7  ;;  %v254_v54 = vmul.f32 0.04, %v253_v49  ;;  %v262_v55 = vadd.f32 %v261_v50, %v645_v2  ;;  %297 = vst [vmem:[#allocation5] sm:$0xff] %v291_v27  ;;  %v346_v37 = vadd.f32 %v338_v19, %v202_v11 }
  0x4d   :  { %v355_v8 = vmul.f32 8.0, %v652_v5  ;;  %v332_v58 = vadd.f32 %v331_v48, %v330_v40  ;;  %v340_v13 = vadd.f32 %v339_v46, %v338_v19  ;;  %v327_v63 = vadd.f32 %v326_v51, %v325_v29 }
  0x4e   :  { %v256_v1 = vrot.slane %v254_v54, 6  ;;  %v263_v59 = vmul.f32 0.04, %v262_v55  ;;  %v282_v60 = vsel %vm268_vm3, %v237_v38, %v246_v53  ;;  %v248_v61 = vsub.f32 %v647_v3, %v246_v53 }
  0x4f   :  { %v354_v62 = vadd.f32 %v346_v37, %v647_v3  ;;  %v341_v0 = vmul.f32 0.04, %v340_v13  ;;  %v348_v9 = vadd.f32 %v347_v52, %v346_v37  ;;  %v363_v14 = vmul.f32 7.0, %v652_v5 }
  0x50   :  { %v265_v2 = vrot.slane %v263_v59, 5  ;;  %v283_v10 = vsel %vm270_vm4, %v282_v60, %v256_v1  ;;  %v258_v11 = vsub.f32 %v647_v3, %v256_v1  ;;  %v292_v12 = vsel %vm268_vm3, %v238_v35, %v248_v61 }
  0x51   :  { %v362_v48 = vadd.f32 %v354_v62, %v656_v7  ;;  %v333_v15 = vmul.f32 0.04, %v332_v58  ;;  %v349_v17 = vmul.f32 0.04, %v348_v9  ;;  %v431_v21 = vrot.slane %v341_v0, 6 }
  0x52   :  { %v284_v18 = vsel %vm272_vm5, %v283_v10, %v265_v2  ;;  %v267_v20 = vsub.f32 %v647_v3, %v265_v2  ;;  %v293_v16 = vsel %vm270_vm4, %v292_v12, %v258_v11  ;;  %v328_v23 = vmul.f32 0.04, %v327_v63 }
  0x53   :  { %296 = vst [vmem:[#allocation6 + $0x8] sm:$0xf] %v284_v18  ;;  %v370_v22 = vadd.f32 %v362_v48, %v173_v43  ;;  %v429_v24 = vrot.slane %v349_v17, 7  ;;  %v371_v7 = vmul.f32 6.0, %v652_v5  ;;  %v379_v30 = vmul.f32 5.0, %v652_v5 }
  0x54   :  { %v294_v29 = vsel %vm272_vm5, %v293_v16, %v267_v20  ;;  %v433_v31 = vrot.slane %v333_v15, 5  ;;  %v356_v33 = vadd.f32 %v355_v8, %v354_v62  ;;  %v436_v34 = vrot.slane %v328_v23, 4 }
  0x55   :  { %298 = vst [vmem:[#allocation5 + $0x8] sm:$0xf] %v294_v29  ;;  %v378_v6 = vadd.f32 %v370_v22, %v163_v41  ;;  %v364_v38 = vadd.f32 %v363_v14, %v362_v48  ;;  %v445_v39 = vsel %vm268_vm3, %v429_v24, %v431_v21  ;;  %v343_v40 = vrot.slane %v341_v0, 2 }
  0x56   :  { %v351_v43 = vrot.slane %v349_v17, 3  ;;  %v387_v44 = vmul.f32 4.0, %v652_v5  ;;  %v392_v45 = vmul.f32 3.0, %v652_v5  ;;  %v372_v25 = vadd.f32 %v371_v7, %v370_v22 }
  0x57   :  { %v386_v42 = vadd.f32 %v378_v6, %v156_v36  ;;  %v380_v26 = vadd.f32 %v379_v30, %v378_v6  ;;  %v446_v28 = vsel %vm270_vm4, %v445_v39, %v433_v31  ;;  %v335_v46 = vrot.slane %v333_v15, 1 }
  0x58   :  { %v837_v47 = vmul.f32 0.04, %v356_v33  ;;  %v400_v49 = vmul.f32 2.0, %v652_v5  ;;  %v842_v50 = vmul.f32 0.04, %v364_v38  ;;  %v447_v36 = vsel %vm272_vm5, %v446_v28, %v436_v34 }
  0x59   :  { %v391_v41 = vadd.f32 %v386_v42, %v153_v32  ;;  %v345_v19 = vsub.f32 %v652_v5, %v343_v40  ;;  %v353_v27 = vsub.f32 %v652_v5, %v351_v43  ;;  %v388_v35 = vadd.f32 %v387_v44, %v386_v42  ;;  %495 = vst [vmem:[#allocation6 + $0x1c] sm:$0xf] %v447_v36 }
  0x5a   :  { %v373_v53 = vmul.f32 0.04, %v372_v25  ;;  %v381_v54 = vmul.f32 0.04, %v380_v26  ;;  %v337_v32 = vsub.f32 %v652_v5, %v335_v46  ;;  %v329_v58 = vsub.f32 %v652_v5, %v328_v23 }
  0x5b   :  { %v393_v51 = vadd.f32 %v392_v45, %v391_v41  ;;  %v399_v52 = vadd.f32 %v391_v41, %v150_v57  ;;  %v359_v13 = vrot.slane %v837_v47, 4  ;;  %v367_v1 = vrot.slane %v842_v50, 5 }
  0x5c   :  { %v473_v59 = vrot.slane %v353_v27, 4  ;;  %v476_v60 = vrot.slane %v345_v19, 4  ;;  %v389_v61 = vmul.f32 0.04, %v388_v35  ;;  %v425_v0 = vrot.slane %v373_v53, 2 }
  0x5d   :  { %v394_v55 = vmul.f32 0.04, %v393_v51  ;;  %v401_v37 = vadd.f32 %v400_v49, %v399_v52  ;;  %v407_v8 = vadd.f32 %v399_v52, %v147_v56  ;;  %v375_v9 = vrot.slane %v373_v53, 6 }
  0x5e   :  { %v383_v2 = vrot.slane %v381_v54, 7  ;;  %v479_v10 = vrot.slane %v337_v32, 4  ;;  %v482_v12 = vrot.slane %v329_v58, 4  ;;  %v421_v14 = vrot.slane %v389_v61, 4 }
  0x5f   :  { %v402_v57 = vmul.f32 0.04, %v401_v37  ;;  %v408_v62 = vadd.f32 %v407_v8, %v652_v5  ;;  %v396_v63 = vrot.slane %v394_v55, 1  ;;  %v418_v48 = vrot.slane %v394_v55, 5 }
  0x60   :  { %v491_v17 = vsel %vm268_vm3, %v473_v59, %v476_v60  ;;  %v390_v20 = vsub.f32 %v649_v4, %v389_v61  ;;  %v423_v22 = vrot.slane %v381_v54, 3  ;;  %v377_v23 = vsub.f32 %v652_v5, %v375_v9 }
  0x61   :  { %v409_v11 = vmul.f32 0.04, %v408_v62  ;;  %v416_v3 = vrot.slane %v402_v57, 6  ;;  %v404_v56 = vrot.slane %v402_v57, 2  ;;  %v398_v15 = vsub.f32 %v649_v4, %v396_v63 }
  0x62   :  { %v385_v24 = vsub.f32 %v652_v5, %v383_v2  ;;  %v492_v29 = vsel %vm270_vm4, %v491_v17, %v479_v10  ;;  %v427_v6 = vrot.slane %v842_v50, 1  ;;  %v369_v38 = vsub.f32 %v652_v5, %v367_v1 }
  0x63   :  { %v414_v18 = vrot.slane %v409_v11, 7  ;;  %v406_v16 = vsub.f32 %v649_v4, %v404_v56  ;;  %v411_v21 = vrot.slane %v409_v11, 3  ;;  %v493_v33 = vsel %vm272_vm5, %v492_v29, %v482_v12 }
  0x64   :  { %v455_v39 = vrot.slane %v398_v15, 4  ;;  %497 = vst [vmem:[#allocation5 + $0x1c] sm:$0xf] %v493_v33  ;;  %v361_v43 = vsub.f32 %v652_v5, %v359_v13  ;;  %v458_v44 = vrot.slane %v390_v20, 4  ;;  %v461_v45 = vrot.slane %v385_v24, 4 }
  0x65   :  { %v438_v7 = vsel %vm268_vm3, %v414_v18, %v416_v3  ;;  %v413_v30 = vsub.f32 %v649_v4, %v411_v21  ;;  %v452_v31 = vrot.slane %v406_v16, 4  ;;  %v464_v26 = vrot.slane %v377_v23, 4 }
  0x66   :  { %v439_v34 = vsel %vm270_vm4, %v438_v7, %v418_v48  ;;  %v467_v41 = vrot.slane %v369_v38, 4  ;;  %v470_v50 = vrot.slane %v361_v43, 4 }
  0x67   :  { %v440_v40 = vsel %vm272_vm5, %v439_v34, %v421_v14  ;;  %v449_v42 = vrot.slane %v413_v30, 4 }
  0x68   :  { %v441_v4 = vsel %vm274_vm6, %v440_v40, %v423_v22 }
  0x69   :  { %v442_v25 = vsel %vm276_vm7, %v441_v4, %v425_v0  ;;  %v484_v28 = vsel %vm268_vm3, %v449_v42, %v452_v31 }
  0x6a   :  { %v443_v46 = vsel %vm278_vm8, %v442_v25, %v427_v6  ;;  %v485_v49 = vsel %vm270_vm4, %v484_v28, %v455_v39 }
  0x6b   :  { %v444_v5 = vsel %vm280_vm9, %v443_v46, %v837_v47  ;;  %v486_v36 = vsel %vm272_vm5, %v485_v49, %v458_v44 }
  0x6c   :  { %494 = vst [vmem:[#allocation6 + $0x14] sm:$0xff] %v444_v5  ;;  %v487_v19 = vsel %vm274_vm6, %v486_v36, %v461_v45 }
  0x6d   :  { %v488_v27 = vsel %vm276_vm7, %v487_v19, %v464_v26 }
  0x6e   :  { %569 = shalt.err (!%p566_p12)
}
  0x6f   :  { %s570_s29 = scalar_lea.hbm %s915_s2, 512 }
  0x70   :  { %p571_p13 = scmp.ne.s32.totalorder %s915_s2, %s570_s29  ;;  %p574_p0 = scmp.lt.u32.totalorder %s570_s29, %s915_s2 }
  0x72   :  { %p576_p1 = pnand %p574_p0, %p571_p13 }
  0x74   :  { %579 = shalt.err (!%p576_p1)
}
  0x75   :  { %521 = dma.vmem_to_hbm [thread:$0]  %s516_s23, 512, %s915_s2, [#allocation7], %s609_s19, %s609_s19, %s610_s20   ;;  %v489_v47 = vsel %vm278_vm8, %v488_v27, %v467_v41 }
  0x76   :  { %v490_v35 = vsel %vm280_vm9, %v489_v47, %v470_v50  ;;  %s580_s8 = scalar_lea.vmem %s504_s25, 512  ;;  %p585_p3 = scmp.lt.s32.totalorder %s504_s25, %s504_s25 }
  0x77   :  { %496 = vst [vmem:[#allocation5 + $0x14] sm:$0xff] %v490_v35  ;;  %p581_p2 = scmp.ne.s32.totalorder %s504_s25, %s580_s8  ;;  %p586_p4 = scmp.lt.s32.totalorder %s580_s8, %s580_s8 }
  0x79   :  { %p587_p5 = por %p586_p4, %p585_p3 }
  0x7b   :  { %p588_p6 = pnand %p587_p5, %p581_p2 }
  0x7d   :  { %591 = shalt.err (!%p588_p6)
}
  0x7e   :  { %s592_s11 = scalar_lea.hbm %s914_s1, 512 }
  0x7f   :  { %p593_p7 = scmp.ne.s32.totalorder %s914_s1, %s592_s11  ;;  %p596_p8 = scmp.lt.u32.totalorder %s592_s11, %s914_s1 }
  0x81   :  { %p598_p9 = pnand %p596_p8, %p593_p7 }
  0x83   :  { %601 = shalt.err (!%p598_p9)
}
  0x84   :  { %509 = dma.vmem_to_hbm [thread:$0]  %s504_s25, 512, %s914_s1, [#allocation4], %s609_s19, %s609_s19, %s610_s20  }
  0x85   :  { %604 = dma.done.wait [#allocation4], 512  }
  0x86   :  { %605 = vsyncadd [#allocation4], 4294966784 }
  0x87   :  { %606 = dma.done.wait [#allocation7], 512  }
  0x88   :  { %607 = vsyncadd [#allocation7], 4294966784 }
  0x89   :  { %528 = vsyncpa [#allocation3], 1 }
  0x8a   :  { %529 = vsyncpa [#allocation4], 1 }
  0x8b   :  { %530 = vsyncpa [#allocation7], 1 }

</bundles_post_ra>
